<compile_context>
chip_gen: v7x
topology: tpu7x:2x2x1
jax: 0.10.0
libtpu: 0.0.40
codegen_flags: <defaults>
</compile_context>

<pallas_src>
import jax
import jax.numpy as jnp
from jax.experimental import pallas as pl
from jax.experimental.pallas import tpu as pltpu


def _round_up(n, m):
    return -(-n // m) * m


# ---------------------------------------------------------------------------
# VMEM budgeting (generation aware).
# ---------------------------------------------------------------------------
def _vmem_budget():
    """Return (vmem_limit_bytes, per_input_buffer_budget_bytes)."""
    cap = None
    try:
        info = pltpu.get_tpu_info()
        cap = int(getattr(info, "vmem_capacity_bytes", None) or 0) or None
    except Exception:
        cap = None
    if cap is None:
        cap = 64 << 20                     # conservative: assume v7x-sized VMEM
    if cap <= (64 << 20):                  # v7x: 64 MiB physical per TensorCore
        limit = 48 << 20
    else:                                  # v5e / v6e: 128 MiB physical
        limit = 64 << 20
    # Double-buffered input ~= 2 * per_buffer = limit / 2; the remaining half
    # covers the (double-buffered) output tile, scratch and compiler temps.
    return limit, limit // 4


def _choose_tb(B, row_bytes, per_buffer):
    """Batch rows per grid step: fill the per-buffer VMEM byte budget (no
    arbitrary row cap), multiple of the f32 sublane count, but keep >= 2 grid
    steps when the batch allows so the 'parallel' axis can shard across
    TensorCores and step-(i+1) DMA overlaps step-i compute."""
    Bp8 = _round_up(B, 8)
    tb = per_buffer // max(row_bytes, 1)
    tb = max(8, (tb // 8) * 8)
    tb = min(tb, Bp8)
    if tb >= Bp8 and Bp8 >= 16:
        tb = max(8, ((Bp8 // 2) // 8) * 8)
    return int(tb)


def _output_fold(D, tb):
    """Fold k = 128 // D batch rows into one lane-dense output row when the
    native (tb, D) store would be lane-masked (D < 128).  Gated so the output
    block keeps an (8, 128)-aligned shape."""
    if D >= 128 or 128 % D != 0:
        return 1
    fold = 128 // D
    if tb % (8 * fold) != 0:
        return 1
    return fold


# ---------------------------------------------------------------------------
# Kernels.
# ---------------------------------------------------------------------------
def _make_single_pass_kernel(fold):
    def kernel(x_ref, w_ref, o_ref):
        x = x_ref[...]                                      # (TB, S, D)
        w = w_ref[...]                                      # (1, D)

        # Attention logits in the native (TB, S, 1) slab layout: a single lane
        # reduce over D, no squeeze / re-broadcast through the XLU.
        scores = jnp.sum(x * w, axis=-1, keepdims=True)     # (TB, S, 1)

        # Numerically stable softmax over S.  The Linear bias is a constant
        # shift over S and cancels exactly in softmax, so it is never loaded.
        m = jnp.max(scores, axis=1, keepdims=True)          # (TB, 1, 1)
        e = jnp.exp(scores - m)                             # (TB, S, 1)
        denom = jnp.sum(e, axis=1)                          # (TB, 1)

        # Weighted sum over S (VPU multiply + sublane reduce); normalization
        # folded into one lane-dense (TB, D) scale.
        acc = jnp.sum(x * e, axis=1)                        # (TB, D)
        out = acc * (1.0 / denom)                           # (TB, D)

        if fold > 1:                                        # lane-dense store
            out = out.reshape(out.shape[0] // fold, fold * out.shape[1])
        o_ref[...] = out.astype(o_ref.dtype)

    return kernel


def _make_online_softmax_kernel(S_actual, ts, fold):
    def kernel(x_ref, w_ref, o_ref, m_sc, l_sc, acc_sc):
        s_idx = pl.program_id(1)

        @pl.when(s_idx == 0)
        def _():
            m_sc[...] = jnp.full_like(m_sc, -jnp.inf)
            l_sc[...] = jnp.zeros_like(l_sc)
            acc_sc[...] = jnp.zeros_like(acc_sc)

        x = x_ref[...]                                      # (TB, TS, D)
        w = w_ref[...]                                      # (1, D)
        scores = jnp.sum(x * w, axis=-1, keepdims=True)     # (TB, TS, 1)

        # Mask padded sequence positions (exact zero contribution to softmax).
        pos = s_idx * ts + jax.lax.broadcasted_iota(jnp.int32, scores.shape, 1)
        valid = pos < S_actual

        m_prev = m_sc[...][:, :, None]                      # (TB, 1, 1)
        tile_max = jnp.max(jnp.where(valid, scores, -jnp.inf),
                           axis=1, keepdims=True)           # (TB, 1, 1)
        m_new = jnp.maximum(m_prev, tile_max)               # (TB, 1, 1)
        alpha = jnp.exp(m_prev - m_new)[:, :, 0]            # (TB, 1)
        e = jnp.where(valid, jnp.exp(scores - m_new), 0.0)  # (TB, TS, 1)

        l_sc[...] = alpha * l_sc[...] + jnp.sum(e, axis=1)            # (TB, 1)
        acc_sc[...] = alpha * acc_sc[...] + jnp.sum(x * e, axis=1)    # (TB, D)
        m_sc[...] = m_new[:, :, 0]

        @pl.when(s_idx == pl.num_programs(1) - 1)
        def _():
            out = acc_sc[...] * (1.0 / l_sc[...])           # (TB, D)
            if fold > 1:
                out = out.reshape(out.shape[0] // fold, fold * out.shape[1])
            o_ref[...] = out.astype(o_ref.dtype)

    return kernel


# ---------------------------------------------------------------------------
# Wrapper.
# ---------------------------------------------------------------------------
def attention_forward(x, weight, bias=None, *, tb=None, ts=None):
    """x: (B, S, D) float32; weight: (1, D) (PyTorch nn.Linear layout); bias: (1,).

    The bias is accepted for API parity but is mathematically redundant
    (softmax over S is invariant to a constant shift), so it is never loaded.
    """
    del bias
    B, S, D = x.shape
    itemsize = jnp.dtype(x.dtype).itemsize

    vmem_limit, per_buffer = _vmem_budget()

    D_pad = _round_up(D, 128)
    # VMEM footprint per batch row of a full-S tile, including the (8, 128)
    # sublane/lane padding Mosaic applies to the last two block dims.
    row_bytes = _round_up(S, 8) * D_pad * itemsize

    w_row = weight.reshape(1, D).astype(x.dtype)

    use_online = (ts is not None) or (8 * row_bytes > per_buffer)

    if not use_online:
        # -------- single pass over S (whole sequence resident per tile) ------
        if tb is None:
            tb = _choose_tb(B, row_bytes, per_buffer)
        tb = max(8, (int(tb) // 8) * 8)

        Bp = _round_up(B, tb)
        if Bp != B:
            # Zero-padded rows: scores 0 -> uniform softmax -> zero output,
            # sliced off afterwards; no NaNs.
            x = jnp.pad(x, ((0, Bp - B), (0, 0), (0, 0)))

        fold = _output_fold(D, tb)

        out = pl.pallas_call(
            _make_single_pass_kernel(fold),
            out_shape=jax.ShapeDtypeStruct((Bp // fold, fold * D), x.dtype),
            grid_spec=pltpu.PrefetchScalarGridSpec(
                num_scalar_prefetch=0,
                grid=(Bp // tb,),
                in_specs=[
                    pl.BlockSpec((tb, S, D), lambda b: (b, 0, 0)),   # batch rows
                    pl.BlockSpec((1, D), lambda b: (0, 0)),          # weight
                ],
                out_specs=pl.BlockSpec((tb // fold, fold * D), lambda b: (b, 0)),
            ),
            compiler_params=pltpu.CompilerParams(
                dimension_semantics=("parallel",),
                vmem_limit_bytes=vmem_limit,
            ),
            cost_estimate=pl.CostEstimate(
                flops=4 * Bp * S * D,
                transcendentals=Bp * S,
                bytes_accessed=(Bp * S * D + Bp * D + D) * itemsize,
            ),
        )(x, w_row)
    else:
        # -------- online-softmax tiling over S ("arbitrary" grid axis) -------
        if tb is None:
            tb = 8                     # minimum batch tile; S carries the DMA size
        tb = max(8, (int(tb) // 8) * 8)
        if ts is None:
            ts = per_buffer // max(tb * D_pad * itemsize, 1)
        ts = max(8, (int(ts) // 8) * 8)
        ts = min(ts, _round_up(S, 8))

        Bp = _round_up(B, tb)
        Sp = _round_up(S, ts)
        pad_b, pad_s = Bp - B, Sp - S
        if pad_b or pad_s:
            x = jnp.pad(x, ((0, pad_b), (0, pad_s), (0, 0)))

        fold = _output_fold(D, tb)

        out = pl.pallas_call(
            _make_online_softmax_kernel(S, ts, fold),
            out_shape=jax.ShapeDtypeStruct((Bp // fold, fold * D), x.dtype),
            grid_spec=pltpu.PrefetchScalarGridSpec(
                num_scalar_prefetch=0,
                grid=(Bp // tb, Sp // ts),
                in_specs=[
                    pl.BlockSpec((tb, ts, D), lambda b, s: (b, s, 0)),
                    pl.BlockSpec((1, D), lambda b, s: (0, 0)),
                ],
                out_specs=pl.BlockSpec((tb // fold, fold * D), lambda b, s: (b, 0)),
                scratch_shapes=[
                    pltpu.VMEM((tb, 1), jnp.float32),   # running max
                    pltpu.VMEM((tb, 1), jnp.float32),   # running denom
                    pltpu.VMEM((tb, D), jnp.float32),   # running weighted sum
                ],
            ),
            compiler_params=pltpu.CompilerParams(
                dimension_semantics=("parallel", "arbitrary"),
                vmem_limit_bytes=vmem_limit,
            ),
            cost_estimate=pl.CostEstimate(
                flops=4 * Bp * Sp * D,
                transcendentals=Bp * Sp,
                bytes_accessed=(Bp * Sp * D + Bp * D + D) * itemsize,
            ),
        )(x, w_row)

    out = out.reshape(Bp, D)
    return out[:B]


def attention_reference(x, weight, bias):
    """Pure-JAX reference matching the PyTorch forward exactly."""
    scores = jnp.einsum("bsd,od->bso", x, weight) + bias      # (B, S, 1)
    w = jax.nn.softmax(scores, axis=1)                        # softmax over S
    w = jnp.squeeze(w, -1)                                    # (B, S)
    return jnp.sum(x * w[..., None], axis=1)                  # (B, D)


if __name__ == "__main__":
    key = jax.random.PRNGKey(0)
    k_x, k_w, k_b, k_x2, k_x3, k_x4 = jax.random.split(key, 6)

    S, D = 8, 32
    bound = 1.0 / (D ** 0.5)
    weight = jax.random.uniform(k_w, (1, D), minval=-bound, maxval=bound,
                                dtype=jnp.float32)
    bias = jax.random.uniform(k_b, (1,), minval=-bound, maxval=bound,
                              dtype=jnp.float32)

    def check(out, ref, name):
        assert out.shape == ref.shape, (name, out.shape, ref.shape)
        err = jnp.max(jnp.abs(out - ref))
        assert jnp.allclose(out, ref, atol=1e-5, rtol=1e-5), (
            f"{name}: max abs err = {err}")

    # 1) Single-pass kernel, 2 "parallel" grid steps (megacore path).
    x = jax.random.normal(k_x, (16, S, D), dtype=jnp.float32)
    out = jax.block_until_ready(attention_forward(x, weight, bias, tb=8))
    check(out, attention_reference(x, weight, bias), "single-pass")

    # 2) Batch not a multiple of 8 -> padding path, auto tile sizing.
    x2 = jax.random.normal(k_x2, (3, S, D), dtype=jnp.float32)
    out2 = jax.block_until_ready(attention_forward(x2, weight, bias))
    check(out2, attention_reference(x2, weight, bias), "batch-pad")

    # 3) Lane-dense folded output store (D=32 -> 4 batch rows per output row).
    x3 = jax.random.normal(k_x3, (64, S, D), dtype=jnp.float32)
    out3 = jax.block_until_ready(attention_forward(x3, weight, bias, tb=32))
    check(out3, attention_reference(x3, weight, bias), "folded-output")

    # 4) Online-softmax S-tiling (forced via small ts); S not a multiple of ts
    #    exercises the in-kernel sequence mask.
    x4 = jax.random.normal(k_x4, (4, 20, D), dtype=jnp.float32)
    out4 = jax.block_until_ready(attention_forward(x4, weight, bias, ts=8))
    check(out4, attention_reference(x4, weight, bias), "online-softmax")

    print("KERNEL_OK")
</pallas_src>

<mosaic_0001>
module attributes {stable_mosaic.version = 11 : i64} {
  func.func @kernel(%arg0: i32, %arg1: memref<8x8x32xf32, #tpu.memory_space<vmem>>, %arg2: memref<1x32xf32, #tpu.memory_space<vmem>>, %arg3: memref<8x32xf32, #tpu.memory_space<vmem>>) attributes {dimension_semantics = [#tpu.dimension_semantics<parallel>], iteration_bounds = array<i64: 2>, scalar_prefetch = 0 : i64, scratch_operands = 0 : i64, tpu.core_type = #tpu.core_type<tc>, window_params = [{transform_indices = @transform_0, window_bounds = array<i64: 8, 8, 32>}, {pipeline_mode = #tpu.pipeline_mode<synchronous>, transform_indices = @transform_1, window_bounds = array<i64: 1, 32>}, {transform_indices = @transform_2, window_bounds = array<i64: 8, 32>}]} {
    %c0 = arith.constant 0 : index
    %c0_0 = arith.constant 0 : index
    %c0_1 = arith.constant 0 : index
    %0 = vector.load %arg1[%c0, %c0_0, %c0_1] : memref<8x8x32xf32, #tpu.memory_space<vmem>>, vector<8x8x32xf32>
    %c0_2 = arith.constant 0 : index
    %c0_3 = arith.constant 0 : index
    %1 = vector.load %arg2[%c0_2, %c0_3] : memref<1x32xf32, #tpu.memory_space<vmem>>, vector<1x32xf32>
    %2 = vector.shape_cast %1 : vector<1x32xf32> to vector<1x1x32xf32>
    %3 = vector.broadcast %2 : vector<1x1x32xf32> to vector<8x8x32xf32>
    %4 = arith.mulf %0, %3 : vector<8x8x32xf32>
    %cst = arith.constant dense<0.000000e+00> : vector<8x8xf32>
    %5 = vector.multi_reduction <add>, %4, %cst [2] : vector<8x8x32xf32> to vector<8x8xf32>
    %6 = vector.shape_cast %5 : vector<8x8xf32> to vector<8x8x1xf32>
    %cst_4 = arith.constant dense<0xFF800000> : vector<8x1xf32>
    %7 = vector.multi_reduction <maximumf>, %6, %cst_4 [1] : vector<8x8x1xf32> to vector<8x1xf32>
    %8 = vector.shape_cast %7 : vector<8x1xf32> to vector<8x1x1xf32>
    %9 = vector.broadcast %8 : vector<8x1x1xf32> to vector<8x8x1xf32>
    %10 = arith.subf %6, %9 : vector<8x8x1xf32>
    %11 = math.exp %10 : vector<8x8x1xf32>
    %cst_5 = arith.constant dense<0.000000e+00> : vector<8x1xf32>
    %12 = vector.multi_reduction <add>, %11, %cst_5 [1] : vector<8x8x1xf32> to vector<8x1xf32>
    %13 = vector.broadcast %11 : vector<8x8x1xf32> to vector<8x8x32xf32>
    %14 = arith.mulf %0, %13 : vector<8x8x32xf32>
    %cst_6 = arith.constant dense<0.000000e+00> : vector<8x32xf32>
    %15 = vector.multi_reduction <add>, %14, %cst_6 [1] : vector<8x8x32xf32> to vector<8x32xf32>
    %cst_7 = arith.constant 1.000000e+00 : f32
    %16 = vector.broadcast %cst_7 : f32 to vector<8x1xf32>
    %17 = arith.divf %16, %12 : vector<8x1xf32>
    %18 = vector.broadcast %17 : vector<8x1xf32> to vector<8x32xf32>
    %19 = arith.mulf %15, %18 : vector<8x32xf32>
    %c0_8 = arith.constant 0 : index
    %c0_9 = arith.constant 0 : index
    %20 = vector.load %arg3[%c0_8, %c0_9] : memref<8x32xf32, #tpu.memory_space<vmem>>, vector<8x32xf32>
    tpu.vector_store %arg3[%c0_8, %c0_9], %19 {strides = array<i32>} : memref<8x32xf32, #tpu.memory_space<vmem>>, vector<8x32xf32>,
    return
  }
  func.func @transform_0(%arg0: i32) -> (i32, i32, i32) {
    %c0_i32 = arith.constant 0 : i32
    %c0_i32_0 = arith.constant 0 : i32
    %c0_i32_1 = arith.constant 0 : i32
    return %arg0, %c0_i32, %c0_i32_0 : i32, i32, i32
  }
  func.func @transform_1(%arg0: i32) -> (i32, i32) {
    %c0_i32 = arith.constant 0 : i32
    %c0_i32_0 = arith.constant 0 : i32
    %c0_i32_1 = arith.constant 0 : i32
    return %c0_i32, %c0_i32_0 : i32, i32
  }
  func.func @transform_2(%arg0: i32) -> (i32, i32) {
    %c0_i32 = arith.constant 0 : i32
    %c0_i32_0 = arith.constant 0 : i32
    return %arg0, %c0_i32 : i32, i32
  }
}

</mosaic_0001>

<bundles_post_ra>
// kernel: tpu_custom_call.1
= control target key start
LH: loop header
LB: loop body
LE: loop exit
PB: predicated region body
PF: predicated region fallthrough
CT: control target
= control target key end

     0   :  { %7 = vsyncpa [#allocation3], 0  ;;  %s957_s0 = inlined_call_operand.hbm [shape: f32[16,8,32], index: 0, kind: input, shape index: {}]   ;;  %s958_s1 = inlined_call_operand.vmem [shape: f32[1,32], index: 1, kind: input, shape index: {}]   ;;  %s959_s2 = inlined_call_operand.hbm [shape: f32[16,32], index: 2, kind: output, shape index: {}]  }
   0x1   :  { %9 = vsyncpa [#allocation3 + $0x1], 0 }
   0x2   :  { %10 = vsyncpa [#allocation4], 0 }
   0x3   :  { %12 = vsyncpa [#allocation4 + $0x1], 0  ;;  %s739_s9 = smov 0   ;;  %s741_s10 = smov 0  }
   0x4   :  { %s743_s11 = smov 0   ;;  %s745_s12 = smov 0  }
   0x5 LB: > { %s760_s13 = sadd.s32 4294967295, %s718_s12   ;;  %s527_s14 = sadd.s32 4294967294, %s718_s12   ;;  %s718_s12 = sphi %s745_s12, %s972_s12   ;;  %s714_s11 = sphi %s743_s11, %s971_s11   ;;  %s710_s10 = sphi %s741_s10, %s970_s10   ;;  %s706_s9 = sphi %s739_s9, %s969_s9  }
   0x6   : > { %s764_s15 = sadd.s32 1, %s718_s12   ;;  %s25_s16 = sadd.s32 1, %s714_s11 }
   0x7   : > { %s22_s17 = ssub.s32 %s718_s12, %s764_s15  ;;  %p32_p0 = scmp.ne.s32.totalorder %s714_s11, %s710_s10 }
   0x8   : > { %p23_p1 = scmp.eq.s32.totalorder %s22_s17, 0  ;;  %p33_p2 = scmp.eq.s32.totalorder %s718_s12, 0 }
   0x9   : > { %p38_p3 = scmp.ne.s32.totalorder %s710_s10, %s706_s9  ;;  %p39_p4 = scmp.eq.s32.totalorder %s760_s13, 0 }
   0xa   : > { %s776_s18 = scalar_select %p23_p1, %s714_s11, %s25_s16  }
   0xb   : > { %p778_p5 = por %p33_p2, %p32_p0  ;;  %p782_p6 = por %p39_p4, %p38_p3 }
   0xc   : > { %p83_p7 = scmp.eq.s32.totalorder %s760_s13, 1  ;;  %p89_p8 = scmp.eq.s32.totalorder %s527_s14, 1 }
   0xd   : > { %p554_p10 = scmp.lt.s32.totalorder %s718_s12, 2  ;;  %s112_s23 = sand.u32 1, %s714_s11  }
   0xe   : > { %p789_p11 = por %p83_p7, %p32_p0  ;;  %p793_p12 = por %p89_p8, %p38_p3 }
   0xf   : > { %s541_s24 = sshll.u32 %s718_s12, 10  ;;  %s530_s25 = sshll.u32 %s112_s23, 6 }
  0x10   : > { %s963_s21 = scalar_select %p789_p11, 1, 0 }
  0x11   : > { %s964_s22 = scalar_select %p793_p12, 1, 0 }
  0x12   : > { %s802_s28 = scalar_lea.hbm %s957_s0, %s541_s24  ;;  %s116_s29 = scalar_lea.vmem [#allocation2], %s530_s25 }
  0x13   : > { %s123_s30 = sshll.u32 %s116_s29, 4  ;;  %p806_p13 = pnand %p554_p10, %p778_p5  ;;  %s810_s30 = int_to_ptr.vmem [resolvable:$true] %s123_s30 }
  0x14   : > { %s812_s4 = scalar_lea.sflag [#allocation3], %s112_s23  ;;  %s622_s5 = scalar_lea.hbm %s802_s28, 1024 }
  0x15   : > { %p623_p0 = scmp.ne.s32.totalorder %s802_s28, %s622_s5  ;;  %p624_p1 = pneg %p806_p13 }
  0x16   : > { %s627_s8 = scalar_lea.hbm %s957_s0, 2048  ;;  %p628_p4 = scmp.lt.u32.totalorder %s802_s28, %s957_s0 }
  0x17   : > { %p625_p2 = pnand %p624_p1, %p623_p0  ;;  %p629_p5 = scmp.lt.u32.totalorder %s627_s8, %s622_s5 }
  0x18   : > { %p631_p8 = scmp.lt.u32.totalorder %s622_s5, %s802_s28 }
  0x19   : > { %p626_p3 = pneg %p625_p2  ;;  %p630_p7 = por %p629_p5, %p628_p4 }
  0x1b   : > { %p632_p10 = por %p631_p8, %p630_p7 }
  0x1d   : > { %p633_p9 = pnand %p632_p10, %p626_p3 }
  0x1f   : > { %636 = shalt.err (!%p633_p9)
}
  0x20   : > { %s637_s17 = scalar_lea.vmem %s810_s30, 1024  ;;  %s720_s19 = smov [#allocation2]  }
  0x21   : > { %p638_p0 = scmp.ne.s32.totalorder %s810_s30, %s637_s17  ;;  %s642_s23 = sshll.u32 %s720_s19, 4  ;;  %s643_s23 = int_to_ptr.vmem [resolvable:$false] %s642_s23 }
  0x22   : > { %s644_s24 = scalar_lea.vmem %s643_s23, 2048  ;;  %p645_p11 = scmp.lt.s32.totalorder %s810_s30, %s643_s23 }
  0x23   : > { %p640_p2 = pnand %p638_p0, %p624_p1  ;;  %p646_p4 = scmp.lt.s32.totalorder %s644_s24, %s637_s17 }
  0x25   : > { %p641_p12 = pneg %p640_p2  ;;  %p647_p5 = por %p646_p4, %p645_p11 }
  0x27   : > { %p648_p7 = pnand %p647_p5, %p641_p12 }
  0x29   : > { %651 = shalt.err (!%p648_p7)
}
  0x2a   : > { %s721_s25 = smov 128   ;;  %s722_s26 = smov 8  }
  0x2b   : > { %549 = dma.hbm_to_vmem [thread:$0]  (!%p806_p13), %s802_s28, 1024, %s810_s30, %s812_s4, %s721_s25, %s721_s25, %s722_s26  }
  0x2c   : > { %p533_p9 = scmp.ge.s32.totalorder %s718_s12, 1  ;;  %p131_p1 = scmp.lt.s32.totalorder %s718_s12, 3 }
  0x2e   : > { %p132_p3 = pnand %p533_p9, %p131_p1 }
  0x2f   : > { %s843_s27 = sand.u32 (!%p132_p3), 1, %s710_s10  }
  0x30   : > { %135 = sbr.rel (%p132_p3) target bundleno = 285 (0x11d), region = 28  ;;  %s534_s29 = sshll.u32 (!%p132_p3), %s843_s27, 6 }
  0x31   : > { %s138_s5 = scalar_lea.sflag (!%p132_p3), [#allocation3], %s843_s27  ;;  %s141_s6 = scalar_lea.vmem (!%p132_p3), [#allocation2], %s534_s29 }
  0x37   : > { %697 = dma.done.wait (%p782_p6), %s138_s5, 1024  }
  0x38   : > { %699 = vsyncadd (%p782_p6), %s138_s5, 4294966272  ;;  %v851_v0 = vld [vmem:[%s141_s6 + $0x10] sm:$0xff]  ;;  %v536_v1 = vld [vmem:[%s958_s1] ss:$0 sm:$0xff]  ;;  %vm186_vm0 = vcmask 261120   ;;  %vm427_vm1 = vcmask 1041409  }
  0x39   : > { %v856_v2 = vld [vmem:[%s141_s6] sm:$0xff]  ;;  %v180_v3 = vmul.f32 %v536_v1, %v851_v0  ;;  %v860_v5 = vld [vmem:[%s141_s6 + $0x18] sm:$0xff]  ;;  %v862_v6 = vld [vmem:[%s141_s6 + $0x8] sm:$0xff]  ;;  %vm429_vm2 = vcmask 1042434   ;;  %s535_s20 = sshll.u32 %s843_s27, 3  ;;  %vm431_vm3 = vcmask 1043459  }
  0x3a   : > { %v178_v4 = vmul.f32 %v536_v1, %v856_v2  ;;  %v181_v7 = vmul.f32 %v536_v1, %v860_v5  ;;  %v179_v8 = vmul.f32 %v536_v1, %v862_v6  ;;  %v866_v9 = vld [vmem:[%s141_s6 + $0x28] sm:$0xff]  ;;  %v868_v10 = vld [vmem:[%s141_s6 + $0x20] sm:$0xff]  ;;  %v876_v17 = vld [vmem:[%s141_s6 + $0x38] sm:$0xff]  ;;  %vm433_vm4 = vcmask 1044484   ;;  %s538_s3 = sshll.u32 %s760_s13, 7  ;;  %s161_s4 = scalar_lea.vmem [#allocation5], %s535_s20 }
  0x3b   : > { %v193_v11 = vsel %vm186_vm0, %v180_v3, 0.0  ;;  %v183_v15 = vmul.f32 %v536_v1, %v866_v9  ;;  %v182_v16 = vmul.f32 %v536_v1, %v868_v10  ;;  %v878_v18 = vld [vmem:[%s141_s6 + $0x30] sm:$0xff]  ;;  %v185_v21 = vmul.f32 %v536_v1, %v876_v17  ;;  %s457_s7 = sshll.u32 %s161_s4, 4  ;;  %s912_s16 = scalar_lea.hbm %s959_s2, %s538_s3  ;;  %s914_s7 = int_to_ptr.vmem [resolvable:$true] %s457_s7 }
  0x3c   : > { %v187_v12 = vsel %vm186_vm0, %v178_v4, 0.0  ;;  %194 = vadd.xlane.f32.xlu1 %v193_v11  ;;  %v196_v13 = vsel %vm186_vm0, %v181_v7, 0.0  ;;  %v190_v14 = vsel %vm186_vm0, %v179_v8, 0.0  ;;  %v184_v22 = vmul.f32 %v536_v1, %v878_v18  ;;  %s444_s13 = scalar_lea.sflag [#allocation4], %s843_s27  ;;  %s652_s17 = scalar_lea.vmem %s914_s7, 128 }
  0x3d   : > { %188 = vadd.xlane.f32.xlu0 %v187_v12  ;;  %v202_v19 = vsel %vm186_vm0, %v183_v15, 0.0  ;;  %v199_v20 = vsel %vm186_vm0, %v182_v16, 0.0  ;;  %v208_v23 = vsel %vm186_vm0, %v185_v21, 0.0  ;;  %vm435_vm5 = vcmask 1045509   ;;  %p653_p6 = scmp.ne.s32.totalorder %s914_s7, %s652_s17  ;;  %p966_p11 = scmp.ne.s32.totalorder %s963_s21, 0 }
  0x3e   : > { %v205_v24 = vsel %vm186_vm0, %v184_v22, 0.0  ;;  %vm437_vm6 = vcmask 1046534   ;;  %vm439_vm7 = vcmask 1047559   ;;  %s723_s19 = smov [#allocation5]  }
  0x3f   : > { %p654_p12 = pnand %p653_p6, %p966_p11  ;;  %s656_s23 = sshll.u32 %s723_s19, 4  ;;  %s657_s23 = int_to_ptr.vmem [resolvable:$false] %s656_s23 }
  0x40   : > { %197 = vadd.xlane.f32.xlu1 %v196_v13  ;;  %s658_s24 = scalar_lea.vmem %s657_s23, 256  ;;  %p659_p8 = scmp.lt.s32.totalorder %s914_s7, %s657_s23 }
  0x41   : > { %191 = vadd.xlane.f32.xlu0 %v190_v14  ;;  %p655_p13 = pneg %p654_p12  ;;  %p660_p10 = scmp.lt.s32.totalorder %s658_s24, %s652_s17 }
  0x43   : > { %p661_p0 = por %p660_p10, %p659_p8 }
  0x44   : > { %203 = vadd.xlane.f32.xlu1 %v202_v19 }
  0x45   : > { %200 = vadd.xlane.f32.xlu0 %v199_v20  ;;  %p662_p2 = pnand %p661_p0, %p655_p13 }
  0x48   : > { %209 = vadd.xlane.f32.xlu1 %v208_v23 }
  0x49   : > { %206 = vadd.xlane.f32.xlu0 %v205_v24 }
  0xc9   : > { %v195_v25 = vpop.xlane.xlu1 %194 }
  0xca   : > { %v189_v26 = vpop.xlane.xlu0 %188  ;;  %v223_v27 = vrot.slane %v195_v25, 4 }
  0xcb   : > { %v211_v28 = vrot.slane %v189_v26, 4 }
  0xcc   : > { %v224_v29 = vmax.f32 %v195_v25, %v223_v27 }
  0xcd   : > { %v212_v30 = vmax.f32 %v189_v26, %v211_v28  ;;  %v198_v31 = vpop.xlane.xlu1 %197 }
  0xce   : > { %v192_v32 = vpop.xlane.xlu0 %191  ;;  %v225_v33 = vrot.slane %v224_v29, 2  ;;  %v229_v35 = vrot.slane %v198_v31, 4 }
  0xcf   : > { %v213_v34 = vrot.slane %v212_v30, 2  ;;  %v217_v36 = vrot.slane %v192_v32, 4 }
  0xd0   : > { %v226_v37 = vmax.f32 %v224_v29, %v225_v33  ;;  %v230_v39 = vmax.f32 %v198_v31, %v229_v35 }
  0xd1   : > { %v214_v38 = vmax.f32 %v212_v30, %v213_v34  ;;  %v218_v40 = vmax.f32 %v192_v32, %v217_v36  ;;  %v204_v41 = vpop.xlane.xlu1 %203 }
  0xd2   : > { %v201_v42 = vpop.xlane.xlu0 %200  ;;  %v227_v43 = vrot.slane %v226_v37, 1  ;;  %v231_v45 = vrot.slane %v230_v39, 2  ;;  %v241_v47 = vrot.slane %v204_v41, 4 }
  0xd3   : > { %v215_v44 = vrot.slane %v214_v38, 1  ;;  %v219_v46 = vrot.slane %v218_v40, 2  ;;  %v235_v48 = vrot.slane %v201_v42, 4 }
  0xd4   : > { %v228_v49 = vmax.f32 %v226_v37, %v227_v43  ;;  %v232_v51 = vmax.f32 %v230_v39, %v231_v45  ;;  %v242_v53 = vmax.f32 %v204_v41, %v241_v47 }
  0xd5   : > { %v216_v50 = vmax.f32 %v214_v38, %v215_v44  ;;  %v220_v52 = vmax.f32 %v218_v40, %v219_v46  ;;  %v236_v54 = vmax.f32 %v201_v42, %v235_v48  ;;  %v210_v55 = vpop.xlane.xlu1 %209 }
  0xd6   : > { %v207_v56 = vpop.xlane.xlu0 %206  ;;  %v261_v57 = vsub.f32 %v195_v25, %v228_v49  ;;  %v233_v59 = vrot.slane %v232_v51, 1  ;;  %v243_v61 = vrot.slane %v242_v53, 2  ;;  %v253_v63 = vrot.slane %v210_v55, 4 }
  0xd7   : > { %v259_v58 = vsub.f32 %v189_v26, %v216_v50  ;;  %v221_v60 = vrot.slane %v220_v52, 1  ;;  %v237_v62 = vrot.slane %v236_v54, 2  ;;  %v247_v1 = vrot.slane %v207_v56, 4 }
  0xd8   : > { %v271_v3 = vmul.f32 1.442695, %v261_v57  ;;  %v234_v7 = vmax.f32 %v232_v51, %v233_v59  ;;  %v244_v11 = vmax.f32 %v242_v53, %v243_v61  ;;  %v254_v13 = vmax.f32 %v210_v55, %v253_v63 }
  0xd9   : > { %v267_v4 = vmul.f32 1.442695, %v259_v58  ;;  %v222_v8 = vmax.f32 %v220_v52, %v221_v60  ;;  %v238_v12 = vmax.f32 %v236_v54, %v237_v62  ;;  %v248_v14 = vmax.f32 %v207_v56, %v247_v1 }
  0xda   : > { %590 = vpow2.f32 %v271_v3  ;;  %v262_v15 = vsub.f32 %v198_v31, %v234_v7  ;;  %v245_v19 = vrot.slane %v244_v11, 1  ;;  %v255_v21 = vrot.slane %v254_v13, 2 }
  0xdb   : > { %v260_v16 = vsub.f32 %v192_v32, %v222_v8  ;;  %592 = vpow2.f32 %v267_v4  ;;  %v239_v20 = vrot.slane %v238_v12, 1  ;;  %v249_v24 = vrot.slane %v248_v14, 2 }
  0xdc   : > { %v273_v22 = vmul.f32 1.442695, %v262_v15  ;;  %v246_v25 = vmax.f32 %v244_v11, %v245_v19  ;;  %v256_v27 = vmax.f32 %v254_v13, %v255_v21 }
  0xdd   : > { %v269_v23 = vmul.f32 1.442695, %v260_v16  ;;  %v240_v26 = vmax.f32 %v238_v12, %v239_v20  ;;  %v250_v28 = vmax.f32 %v248_v14, %v249_v24 }
  0xde   : > { %594 = vpow2.f32 %v273_v22  ;;  %v264_v29 = vsub.f32 %v204_v41, %v246_v25  ;;  %v257_v33 = vrot.slane %v256_v27, 1 }
  0xdf   : > { %596 = vpow2.f32 %v269_v23  ;;  %v263_v30 = vsub.f32 %v201_v42, %v240_v26  ;;  %v251_v34 = vrot.slane %v250_v28, 1 }
  0xe0   : > { %v277_v35 = vmul.f32 1.442695, %v264_v29  ;;  %v258_v32 = vmax.f32 %v256_v27, %v257_v33 }
  0xe1   : > { %v275_v31 = vmul.f32 1.442695, %v263_v30  ;;  %v252_v36 = vmax.f32 %v250_v28, %v251_v34 }
  0xe2   : > { %598 = vpow2.f32 %v277_v35  ;;  %v266_v37 = vsub.f32 %v210_v55, %v258_v32 }
  0xe3   : > { %600 = vpow2.f32 %v275_v31  ;;  %v265_v39 = vsub.f32 %v207_v56, %v252_v36 }
  0xe4   : > { %v591_v38 = vpop.eup %590  ;;  %v281_v45 = vmul.f32 1.442695, %v266_v37 }
  0xe5   : > { %v593_v40 = vpop.eup %592  ;;  %v295_v43 = vrot.slane %v591_v38, 4  ;;  %v333_v44 = vmul.f32 %v591_v38, %v851_v0  ;;  %v279_v42 = vmul.f32 1.442695, %v265_v39 }
  0xe6   : > { %v283_v46 = vrot.slane %v593_v40, 4  ;;  %v331_v41 = vmul.f32 %v593_v40, %v856_v2  ;;  %602 = vpow2.f32 %v281_v45 }
  0xe7   : > { %v296_v47 = vadd.f32 %v591_v38, %v295_v43  ;;  %v353_v48 = vsel %vm186_vm0, %v333_v44, 0.0  ;;  %604 = vpow2.f32 %v279_v42 }
  0xe8   : > { %v595_v49 = vpop.eup %594  ;;  %v354_v50 = vrot.slane %v353_v48, 4  ;;  %v284_v51 = vadd.f32 %v593_v40, %v283_v46  ;;  %v339_v52 = vsel %vm186_vm0, %v331_v41, 0.0 }
  0xe9   : > { %v597_v53 = vpop.eup %596  ;;  %v297_v54 = vrot.slane %v296_v47, 2  ;;  %v340_v55 = vrot.slane %v339_v52, 4  ;;  %v301_v56 = vrot.slane %v595_v49, 4  ;;  %v334_v0 = vmul.f32 %v595_v49, %v860_v5 }
  0xea   : > { %v285_v57 = vrot.slane %v284_v51, 2  ;;  %v289_v58 = vrot.slane %v597_v53, 4  ;;  %v332_v2 = vmul.f32 %v597_v53, %v862_v6  ;;  %v355_v59 = vadd.f32 %v354_v50, %v353_v48 }
  0xeb   : > { %v298_v60 = vadd.f32 %v297_v54, %v296_v47  ;;  %v341_v61 = vadd.f32 %v340_v55, %v339_v52  ;;  %v302_v62 = vadd.f32 %v595_v49, %v301_v56  ;;  %v893_v63 = vsel %vm186_vm0, %v334_v0, 0.0 }
  0xec   : > { %v286_v1 = vadd.f32 %v285_v57, %v284_v51  ;;  %v290_v3 = vadd.f32 %v597_v53, %v289_v58  ;;  %v346_v4 = vsel %vm186_vm0, %v332_v2, 0.0  ;;  %v356_v7 = vrot.slane %v355_v59, 2  ;;  %v599_v8 = vpop.eup %598 }
  0xed   : > { %v299_v11 = vrot.slane %v298_v60, 1  ;;  %v303_v12 = vrot.slane %v302_v62, 2  ;;  %v347_v5 = vrot.slane %v346_v4, 4  ;;  %v342_v13 = vrot.slane %v341_v61, 2  ;;  %v601_v14 = vpop.eup %600 }
  0xee   : > { %v287_v15 = vrot.slane %v286_v1, 1  ;;  %v291_v6 = vrot.slane %v290_v3, 2  ;;  %v313_v16 = vrot.slane %v599_v8, 4  ;;  %v336_v19 = vmul.f32 %v599_v8, %v866_v9 }
  0xef   : > { %v300_v20 = vadd.f32 %v299_v11, %v298_v60  ;;  %v304_v21 = vadd.f32 %v303_v12, %v302_v62  ;;  %v348_v22 = vadd.f32 %v347_v5, %v346_v4  ;;  %v307_v23 = vrot.slane %v601_v14, 4 }
  0xf0   : > { %v288_v24 = vadd.f32 %v287_v15, %v286_v1  ;;  %v292_v25 = vadd.f32 %v291_v6, %v290_v3  ;;  %v314_v26 = vadd.f32 %v599_v8, %v313_v16  ;;  %v335_v27 = vmul.f32 %v601_v14, %v868_v10  ;;  %v603_v28 = vpop.eup %602 }
  0xf1   : > { %606 = vrcp.f32 %v300_v20  ;;  %v305_v29 = vrot.slane %v304_v21, 1  ;;  %v308_v30 = vadd.f32 %v601_v14, %v307_v23  ;;  %v343_v33 = vadd.f32 %v342_v13, %v341_v61  ;;  %v605_v34 = vpop.eup %604 }
  0xf2   : > { %608 = vrcp.f32 %v288_v24  ;;  %v293_v35 = vrot.slane %v292_v25, 1  ;;  %v315_v31 = vrot.slane %v314_v26, 2  ;;  %v325_v32 = vrot.slane %v603_v28, 4 }
  0xf3   : > { %v306_v9 = vadd.f32 %v305_v29, %v304_v21  ;;  %v309_v36 = vrot.slane %v308_v30, 2  ;;  %v319_v37 = vrot.slane %v605_v34, 4  ;;  %v337_v38 = vmul.f32 %v605_v34, %v878_v18 }
  0xf4   : > { %v294_v39 = vadd.f32 %v293_v35, %v292_v25  ;;  %v316_v40 = vadd.f32 %v315_v31, %v314_v26  ;;  %v326_v43 = vadd.f32 %v603_v28, %v325_v32  ;;  %v338_v10 = vmul.f32 %v603_v28, %v876_v17 }
  0xf5   : > { %610 = vrcp.f32 %v306_v9  ;;  %v310_v44 = vadd.f32 %v309_v36, %v308_v30  ;;  %v320_v45 = vadd.f32 %v605_v34, %v319_v37  ;;  %v344_v46 = vrot.slane %v343_v33, 1 }
  0xf6   : > { %612 = vrcp.f32 %v294_v39  ;;  %v327_v41 = vrot.slane %v326_v43, 2  ;;  %v317_v42 = vrot.slane %v316_v40, 1  ;;  %v349_v47 = vrot.slane %v348_v22, 2 }
  0xf7   : > { %v311_v48 = vrot.slane %v310_v44, 1  ;;  %v321_v49 = vrot.slane %v320_v45, 2  ;;  %v345_v50 = vadd.f32 %v344_v46, %v343_v33  ;;  %v357_v51 = vadd.f32 %v356_v7, %v355_v59 }
  0xf8   : > { %v318_v52 = vadd.f32 %v317_v42, %v316_v40  ;;  %v328_v53 = vadd.f32 %v327_v41, %v326_v43  ;;  %v350_v18 = vadd.f32 %v349_v47, %v348_v22  ;;  %v361_v54 = vrot.slane %v893_v63, 4 }
  0xf9   : > { %v322_v55 = vadd.f32 %v321_v49, %v320_v45  ;;  %v312_v17 = vadd.f32 %v311_v48, %v310_v44  ;;  %v358_v56 = vrot.slane %v357_v51, 1  ;;  %v367_v0 = vsel %vm186_vm0, %v335_v27, 0.0 }
  0xfa   : > { %v329_v57 = vrot.slane %v328_v53, 1  ;;  %v351_v58 = vrot.slane %v350_v18, 1  ;;  %v362_v2 = vadd.f32 %v361_v54, %v893_v63  ;;  %v368_v60 = vrot.slane %v367_v0, 4 }
  0xfb   : > { %v607_v61 = vpop.eup %606  ;;  %v323_v62 = vrot.slane %v322_v55, 1  ;;  %v359_v1 = vadd.f32 %v358_v56, %v357_v51  ;;  %v374_v59 = vsel %vm186_vm0, %v336_v19, 0.0  ;;  %v381_v3 = vsel %vm186_vm0, %v337_v38, 0.0 }
  0xfc   : > { %v609_v4 = vpop.eup %608  ;;  %v330_v7 = vadd.f32 %v329_v57, %v328_v53  ;;  %v352_v8 = vadd.f32 %v351_v58, %v350_v18  ;;  %v363_v11 = vrot.slane %v362_v2, 2  ;;  %v369_v12 = vadd.f32 %v368_v60, %v367_v0 }
  0xfd   : > { %v324_v5 = vadd.f32 %v323_v62, %v322_v55  ;;  %v375_v13 = vrot.slane %v374_v59, 4  ;;  %v382_v14 = vrot.slane %v381_v3, 4  ;;  %v388_v15 = vsel %vm186_vm0, %v338_v10, 0.0 }
  0xfe   : > { %v364_v6 = vadd.f32 %v363_v11, %v362_v2  ;;  %v370_v63 = vrot.slane %v369_v12, 2  ;;  %v389_v16 = vrot.slane %v388_v15, 4  ;;  %614 = vrcp.f32 %v312_v17 }
  0xff   : > { %v611_v20 = vpop.eup %610  ;;  %v376_v21 = vadd.f32 %v375_v13, %v374_v59  ;;  %v383_v22 = vadd.f32 %v382_v14, %v381_v3  ;;  %616 = vrcp.f32 %v318_v52  ;;  %v411_v19 = vmul.f32 %v609_v4, %v345_v50 }
 0x100   : > { %v613_v23 = vpop.eup %612  ;;  %v365_v24 = vrot.slane %v364_v6, 1  ;;  %v371_v25 = vadd.f32 %v370_v63, %v369_v12  ;;  %v390_v26 = vadd.f32 %v389_v16, %v388_v15  ;;  %618 = vrcp.f32 %v324_v5 }
 0x101   : > { %v377_v27 = vrot.slane %v376_v21, 2  ;;  %v384_v28 = vrot.slane %v383_v22, 2  ;;  %620 = vrcp.f32 %v330_v7  ;;  %v412_v29 = vmul.f32 %v613_v23, %v352_v8 }
 0x102   : > { %v372_v30 = vrot.slane %v371_v25, 1  ;;  %v391_v33 = vrot.slane %v390_v26, 2  ;;  %v413_v31 = vmul.f32 %v607_v61, %v359_v1  ;;  %v366_v9 = vadd.f32 %v365_v24, %v364_v6 }
 0x103   : > { %v378_v34 = vadd.f32 %v377_v27, %v376_v21  ;;  %v385_v35 = vadd.f32 %v384_v28, %v383_v22  ;;  %v428_v32 = vsel %vm427_vm1, %v412_v29, %v411_v19 }
 0x104   : > { %v392_v36 = vadd.f32 %v391_v33, %v390_v26  ;;  %v430_v39 = vsel %vm429_vm2, %v413_v31, %v428_v32  ;;  %v414_v43 = vmul.f32 %v611_v20, %v366_v9  ;;  %v373_v10 = vadd.f32 %v372_v30, %v371_v25 }
 0x105   : > { %v379_v37 = vrot.slane %v378_v34, 1  ;;  %v386_v38 = vrot.slane %v385_v35, 1 }
 0x106   : > { %v393_v40 = vrot.slane %v392_v36, 1  ;;  %v432_v46 = vsel %vm431_vm3, %v414_v43, %v430_v39 }
 0x107   : > { %v380_v45 = vadd.f32 %v379_v37, %v378_v34  ;;  %v387_v42 = vadd.f32 %v386_v38, %v385_v35 }
 0x108   : > { %v615_v44 = vpop.eup %614  ;;  %v394_v49 = vadd.f32 %v393_v40, %v392_v36 }
 0x109   : > { %v617_v41 = vpop.eup %616  ;;  %v415_v47 = vmul.f32 %v615_v44, %v373_v10 }
 0x10a   : > { %v619_v48 = vpop.eup %618  ;;  %v416_v50 = vmul.f32 %v617_v41, %v380_v45 }
 0x10b   : > { %v621_v51 = vpop.eup %620  ;;  %v417_v52 = vmul.f32 %v619_v48, %v387_v42  ;;  %v434_v53 = vsel %vm433_vm4, %v415_v47, %v432_v46 }
 0x10c   : > { %v418_v18 = vmul.f32 %v621_v51, %v394_v49  ;;  %v436_v54 = vsel %vm435_vm5, %v416_v50, %v434_v53 }
 0x10d   : > { %v438_v55 = vsel %vm437_vm6, %v417_v52, %v436_v54 }
 0x10e   : > { %v440_v17 = vsel %vm439_vm7, %v418_v18, %v438_v55 }
 0x10f   : > { %442 = vst.msk [vmem:[%s161_s4] sm:$0xff] %vm186_vm0, %v440_v17 }
 0x110   : > { %665 = shalt.err (!%p662_p2)
}
 0x111   : > { %s666_s25 = scalar_lea.hbm %s912_s16, 128  ;;  %s670_s29 = scalar_lea.hbm %s959_s2, 256 }
 0x112   : > { %p667_p4 = scmp.ne.s32.totalorder %s912_s16, %s666_s25  ;;  %p671_p9 = scmp.lt.u32.totalorder %s912_s16, %s959_s2 }
 0x113   : > { %p672_p1 = scmp.lt.u32.totalorder %s670_s29, %s666_s25  ;;  %p674_p6 = scmp.lt.u32.totalorder %s666_s25, %s912_s16 }
 0x114   : > { %p668_p5 = pnand %p667_p4, %p966_p11 }
 0x115   : > { %p673_p3 = por %p672_p1, %p671_p9 }
 0x116   : > { %p669_p7 = pneg %p668_p5 }
 0x117   : > { %p675_p12 = por %p674_p6, %p673_p3 }
 0x119   : > { %p676_p13 = pnand %p675_p12, %p669_p7 }
 0x11b   : > { %679 = shalt.err (!%p676_p13)
}
 0x11c   : > { %544 = dma.vmem_to_hbm [thread:$0]  (%p966_p11), %s914_s7, 128, %s912_s16, %s444_s13  }
 0x11d PF: > { %s469_s28 = sand.u32 1, %s706_s9   ;;  %p967_p8 = scmp.ne.s32.totalorder %s964_s22, 0 }
 0x11e   : > { %p968_p10 = scmp.ge.s32.totalorder %s718_s12, 2  ;;  %s470_s30 = scalar_lea.sflag [#allocation4], %s469_s28 }
 0x120   : > { %p551_p0 = pnand %p968_p10, %p967_p8 }
 0x122   : > { %701 = dma.done.wait (!%p551_p0), %s470_s30, 128  }
 0x123   : > { %703 = vsyncadd (!%p551_p0), %s470_s30, 4294967168  ;;  %p15_p2 = scmp.ge.s32.totalorder %s764_s15, 4   ;;  %s969_s9 = smov %s710_s10 }
 0x124   : > { %s970_s10 = smov %s714_s11  ;;  %s971_s11 = smov %s776_s18 }
 0x125   : > { %s972_s12 = smov %s764_s15  ;;  %17 = sbr.rel (!%p15_p2) target bundleno = 5 (0x5), region = 73 }
 0x12c   :  { %475 = vsyncpa [#allocation3], 1 }
 0x12d   :  { %477 = vsyncpa [#allocation3 + $0x1], 1 }
 0x12e   :  { %478 = vsyncpa [#allocation4], 1 }
 0x12f   :  { %480 = vsyncpa [#allocation4 + $0x1], 1 }

</bundles_post_ra>
